<compile_context>
chip_gen: v7x
topology: tpu7x:2x2x1
jax: 0.10.0
libtpu: 0.0.40
codegen_flags: <defaults>
</compile_context>

<pallas_src>
import functools

import jax
import jax.numpy as jnp
from jax.experimental import pallas as pl
from jax.experimental.pallas import tpu as pltpu


_LANE = 128             # lane width of the flattened slab (full vreg lanes)
_MAX_BLOCK_ROWS = 1024  # 1024 x 128 x 4 B = 512 KiB per f32 tile


def _round_up(a, b):
    return ((a + b - 1) // b) * b


def _rezero_kernel(g_ref, x_ref, o_ref, *, fn):
    # g_ref: SMEM (1,) f32 scalar;  x_ref / o_ref: (block_rows, 128) VMEM tiles.
    y = x_ref[...]
    if fn is not None:
        y = fn(y)                        # elementwise fn fused into the kernel
    o_ref[...] = (y.astype(jnp.float32) * g_ref[0]).astype(o_ref.dtype)


def rezero_pallas(x, g, fn=None):
    """Rezero forward: fn(x) * g.

    `fn`, if given, must be an elementwise (shape-preserving) JAX function; it
    is fused into the Pallas kernel so the whole op is one HBM read + write.
    # TODO(synk): a non-elementwise fn (e.g. the LinearAttention this wraps in
    # diff_f0.py) must be applied by the caller before this kernel; only the
    # ReZero scaling (+ elementwise fn) is expressed in Pallas.
    """
    orig_shape = x.shape
    orig_dtype = x.dtype
    total = x.size

    rows0 = (total + _LANE - 1) // _LANE
    block_rows = min(_MAX_BLOCK_ROWS, _round_up(max(rows0, 1), 8))
    rows = _round_up(rows0, block_rows)
    padded_total = rows * _LANE

    flat = jnp.ravel(x)                  # contiguous view, no HBM copy
    if padded_total != total:
        flat = jnp.pad(flat, (0, padded_total - total))
    x2d = flat.reshape(rows, _LANE)

    g_arr = jnp.asarray(g, jnp.float32).reshape(1)

    out2d = pl.pallas_call(
        functools.partial(_rezero_kernel, fn=fn),
        out_shape=jax.ShapeDtypeStruct((rows, _LANE), orig_dtype),
        grid_spec=pltpu.PrefetchScalarGridSpec(
            num_scalar_prefetch=0,
            grid=(rows // block_rows,),
            in_specs=[
                pl.BlockSpec(memory_space=pltpu.MemorySpace.SMEM),   # g scalar
                pl.BlockSpec((block_rows, _LANE), lambda i: (i, 0)),  # x tile
            ],
            out_specs=pl.BlockSpec((block_rows, _LANE), lambda i: (i, 0)),
        ),
        compiler_params=pltpu.CompilerParams(
            dimension_semantics=("parallel",)),
    )(g_arr, x2d)

    return out2d.reshape(-1)[:total].reshape(orig_shape)


if __name__ == "__main__":
    # Small shapes consistent with Rezero wrapping a (B, C, H, W) feature map
    # in the diffusion U-Net: batch=2, channels=4, spatial 16x16.
    N, C, H, W = 2, 4, 16, 16
    key = jax.random.PRNGKey(0)
    kx, kg = jax.random.split(key, 2)

    x = jax.random.normal(kx, (N, C, H, W), dtype=jnp.float32)

    # 1) PyTorch init: g = 0  ->  output must be exactly zeros (any fn).
    g0 = jnp.zeros((1,), jnp.float32)
    out0 = jax.block_until_ready(rezero_pallas(x, g0, fn=jnp.tanh))
    assert out0.shape == x.shape
    assert jnp.allclose(out0, jnp.zeros_like(x))

    # 2) Trained-like scalar g != 0, identity fn (pure ReZero scaling).
    g1 = jax.random.normal(kg, (1,), dtype=jnp.float32)
    out1 = jax.block_until_ready(rezero_pallas(x, g1, fn=None))
    ref1 = x * g1[0]
    assert jnp.allclose(out1, ref1, atol=1e-6, rtol=1e-6)

    # 3) Same g with an elementwise fn fused inside the kernel.
    out2 = jax.block_until_ready(rezero_pallas(x, g1, fn=jnp.tanh))
    ref2 = jnp.tanh(x) * g1[0]
    assert jnp.allclose(out2, ref2, atol=1e-4, rtol=1e-4)

    print("KERNEL_OK")
</pallas_src>

<mosaic_0001>
module attributes {stable_mosaic.version = 11 : i64} {
  func.func @_rezero_kernel(%arg0: i32, %arg1: memref<1xf32, #tpu.memory_space<smem>>, %arg2: memref<16x128xf32, #tpu.memory_space<vmem>>, %arg3: memref<16x128xf32, #tpu.memory_space<vmem>>) attributes {dimension_semantics = [#tpu.dimension_semantics<parallel>], iteration_bounds = array<i64: 1>, scalar_prefetch = 0 : i64, scratch_operands = 0 : i64, tpu.core_type = #tpu.core_type<tc>, window_params = [{transform_indices = @transform_0, window_bounds = array<i64: 1>}, {transform_indices = @transform_1, window_bounds = array<i64: 16, 128>}, {transform_indices = @transform_2, window_bounds = array<i64: 16, 128>}]} {
    %c0 = arith.constant 0 : index
    %c0_0 = arith.constant 0 : index
    %0 = vector.load %arg2[%c0, %c0_0] : memref<16x128xf32, #tpu.memory_space<vmem>>, vector<16x128xf32>
    %1 = math.tanh %0 : vector<16x128xf32>
    %c0_1 = arith.constant 0 : index
    %2 = memref.load %arg1[%c0_1] : memref<1xf32, #tpu.memory_space<smem>>
    %3 = vector.broadcast %2 : f32 to vector<16x128xf32>
    %4 = arith.mulf %1, %3 : vector<16x128xf32>
    %c0_2 = arith.constant 0 : index
    %c0_3 = arith.constant 0 : index
    %5 = vector.load %arg3[%c0_2, %c0_3] : memref<16x128xf32, #tpu.memory_space<vmem>>, vector<16x128xf32>
    tpu.vector_store %arg3[%c0_2, %c0_3], %4 {strides = array<i32>} : memref<16x128xf32, #tpu.memory_space<vmem>>, vector<16x128xf32>,
    return
  }
  func.func @transform_0(%arg0: i32) -> i32 {
    %c0_i32 = arith.constant 0 : i32
    %c0_i32_0 = arith.constant 0 : i32
    return %c0_i32 : i32
  }
  func.func @transform_1(%arg0: i32) -> (i32, i32) {
    %c0_i32 = arith.constant 0 : i32
    %c0_i32_0 = arith.constant 0 : i32
    return %arg0, %c0_i32 : i32, i32
  }
  func.func @transform_2(%arg0: i32) -> (i32, i32) {
    %c0_i32 = arith.constant 0 : i32
    %c0_i32_0 = arith.constant 0 : i32
    return %arg0, %c0_i32 : i32, i32
  }
}

</mosaic_0001>

<bundles_post_ra>
// kernel: tpu_custom_call.1
= control target key start
LH: loop header
LB: loop body
LE: loop exit
PB: predicated region body
PF: predicated region fallthrough
CT: control target
= control target key end

     0   :  { %8 = vsyncpa [#allocation4], 0  ;;  %s162_s0 = inlined_call_operand.<no memory space> [shape: f32[1], index: 0, kind: input, shape index: {}]   ;;  %s163_s1 = inlined_call_operand.hbm [shape: f32[16,128], index: 1, kind: input, shape index: {}]   ;;  %s164_s2 = inlined_call_operand.hbm [shape: f32[16,128], index: 2, kind: output, shape index: {}]  }
   0x1   :  { %9 = vsyncpa [#allocation5], 0  ;;  %s110_s9 = smov [#allocation3]   ;;  %s62_s13 = scalar_lea.hbm %s163_s1, 256 }
   0x2   :  { %s17_s10 = sshll.u32 %s110_s9, 4  ;;  %p63_p0 = scmp.ne.s32.totalorder %s163_s1, %s62_s13  ;;  %s18_s10 = int_to_ptr.vmem [resolvable:$true] %s17_s10 }
   0x3   :  { %p66_p1 = scmp.lt.u32.totalorder %s62_s13, %s163_s1 }
   0x5   :  { %p68_p2 = pnand %p66_p1, %p63_p0 }
   0x7   :  { %71 = shalt.err (!%p68_p2)
}
   0x8   :  { %s72_s18 = scalar_lea.vmem %s18_s10, 256  ;;  %p77_p4 = scmp.lt.s32.totalorder %s18_s10, %s18_s10 }
   0x9   :  { %p73_p3 = scmp.ne.s32.totalorder %s18_s10, %s72_s18  ;;  %p78_p5 = scmp.lt.s32.totalorder %s72_s18, %s72_s18 }
   0xb   :  { %p79_p6 = por %p78_p5, %p77_p4 }
   0xd   :  { %p80_p7 = pnand %p79_p6, %p73_p3 }
   0xf   :  { %83 = shalt.err (!%p80_p7)
}
  0x10   :  { %s111_s19 = smov 128   ;;  %s112_s20 = smov 8  }
  0x11   :  { %23 = dma.hbm_to_vmem [thread:$0]  %s163_s1, 256, %s18_s10, [#allocation4], %s111_s19, %s111_s19, %s112_s20  }
  0x12   :  { %106 = dma.done.wait [#allocation4], 256  }
  0x13   :  { %107 = vsyncadd [#allocation4], 4294967040  ;;  %v27_v0 = vld [vmem:[#allocation3] sm:$0xff]  ;;  %v28_v1 = vld [vmem:[#allocation3 + $0x8] sm:$0xff]  ;;  %v32_v2 = vstv %s162_s0  ;;  %s113_s25 = smov [#allocation6]  }
  0x14   :  { %58 = vtanh.f32 %v27_v0  ;;  %s42_s26 = sshll.u32 %s113_s25, 4  ;;  %s43_s26 = int_to_ptr.vmem [resolvable:$true] %s42_s26 }
  0x15   :  { %60 = vtanh.f32 %v28_v1  ;;  %s84_s1 = scalar_lea.vmem %s43_s26, 256  ;;  %p89_p9 = scmp.lt.s32.totalorder %s43_s26, %s43_s26 }
  0x16   :  { %p85_p8 = scmp.ne.s32.totalorder %s43_s26, %s84_s1  ;;  %p90_p10 = scmp.lt.s32.totalorder %s84_s1, %s84_s1 }
  0x18   :  { %p91_p11 = por %p90_p10, %p89_p9 }
  0x1a   :  { %p92_p12 = pnand %p91_p11, %p85_p8 }
  0x1e   :  { %v59_v3 = vpop.eup %58 }
  0x1f   :  { %v61_v4 = vpop.eup %60  ;;  %v33_v5 = vmul.f32 %v59_v3, %v32_v2 }
  0x20   :  { %v34_v6 = vmul.f32 %v61_v4, %v32_v2 }
  0x21   :  { %35 = vst [vmem:[#allocation6] sm:$0xff] %v33_v5 }
  0x22   :  { %36 = vst [vmem:[#allocation6 + $0x8] sm:$0xff] %v34_v6 }
  0x23   :  { %95 = shalt.err (!%p92_p12)
}
  0x24   :  { %s96_s0 = scalar_lea.hbm %s164_s2, 256 }
  0x25   :  { %p97_p13 = scmp.ne.s32.totalorder %s164_s2, %s96_s0  ;;  %p100_p0 = scmp.lt.u32.totalorder %s96_s0, %s164_s2 }
  0x27   :  { %p102_p1 = pnand %p100_p0, %p97_p13 }
  0x29   :  { %105 = shalt.err (!%p102_p1)
}
  0x2a   :  { %48 = dma.vmem_to_hbm [thread:$0]  %s43_s26, 256, %s164_s2, [#allocation5], %s111_s19, %s111_s19, %s112_s20  }
  0x2b   :  { %108 = dma.done.wait [#allocation5], 256  }
  0x2c   :  { %109 = vsyncadd [#allocation5], 4294967040 }
  0x2d   :  { %52 = vsyncpa [#allocation4], 1 }
  0x2e   :  { %53 = vsyncpa [#allocation5], 1 }

</bundles_post_ra>
